<compile_context>
chip_gen: v6e
topology: v6e:2x2x1
jax: 0.10.0
libtpu: 0.0.40
codegen_flags: <defaults>
</compile_context>

<pallas_src>
import functools
import math

import jax
import jax.numpy as jnp
from jax import lax
from jax.experimental import pallas as pl
from jax.experimental.pallas import tpu as pltpu


# ----------------------- per-chip budgets / tile targets ---------------------

def _vmem_capacity_bytes():
    try:
        info = pltpu.get_tpu_info()
        cap = getattr(info, "vmem_capacity_bytes", None)
        if cap:
            return int(cap)
    except Exception:
        pass
    return 64 * 1024 * 1024          # conservative (v7x-sized) fallback


_VMEM_PHYS = _vmem_capacity_bytes()
_VMEM_LIMIT = (_VMEM_PHYS * 7) // 8          # ~56 MiB on v7x, ~112 MiB on v5e/v6e
_BIG_VMEM = _VMEM_PHYS >= 96 * 1024 * 1024   # v5e / v6e


def _proj_tile_targets():
    # Bigger tiles on v5e/v6e (128 MiB physical VMEM) cut redundant HBM re-reads
    # of x / W and per-step grid overhead; keep a smaller footprint on v7x.
    if _BIG_VMEM:
        return 512, 512, 1024
    return 256, 256, 512


def _aligned_tile(dim, target, granule):
    """Largest multiple of `granule` <= target that divides `dim`; falls back to
    the full dim (a full-extent block is always a legal Mosaic block)."""
    if dim <= target:
        return dim
    if dim % granule == 0:
        t = (min(target, dim) // granule) * granule
        while t >= granule:
            if dim % t == 0:
                return t
            t -= granule
    return dim


# ------------------------------- Pallas kernels -------------------------------

def _proj_bias_kernel(x_ref, w_ref, b_ref, o_ref, acc_ref):
    # x:(tm,tk), w:(tn,tk) [nn.Linear layout], b:(1,tn), o:(tm,tn); f32 accumulate.
    k = pl.program_id(2)

    @pl.when(k == 0)
    def _():
        acc_ref[...] = jnp.zeros_like(acc_ref)

    acc_ref[...] += lax.dot_general(
        x_ref[...], w_ref[...],
        dimension_numbers=(((1,), (1,)), ((), ())),
        preferred_element_type=jnp.float32)

    @pl.when(k == pl.num_programs(2) - 1)
    def _():
        o_ref[...] = (acc_ref[...] + b_ref[...].astype(jnp.float32)).astype(o_ref.dtype)


def _proj_kernel(x_ref, w_ref, o_ref, acc_ref):
    k = pl.program_id(2)

    @pl.when(k == 0)
    def _():
        acc_ref[...] = jnp.zeros_like(acc_ref)

    acc_ref[...] += lax.dot_general(
        x_ref[...], w_ref[...],
        dimension_numbers=(((1,), (1,)), ((), ())),
        preferred_element_type=jnp.float32)

    @pl.when(k == pl.num_programs(2) - 1)
    def _():
        o_ref[...] = acc_ref[...].astype(o_ref.dtype)


def _qkv_proj_kernel(x_ref, w_ref, b_ref, o_ref, acc_ref, *, hpb, dh):
    # Writes the QKV projection directly in (3, B, H, N, Dh) layout: the output
    # block is (1, 1, hpb, tm, Dh); the (tm, tn=hpb*Dh) f32 accumulator is split
    # per head on the final K step.  This removes the host-side 5-D relayout pass.
    k = pl.program_id(2)

    @pl.when(k == 0)
    def _():
        acc_ref[...] = jnp.zeros_like(acc_ref)

    acc_ref[...] += lax.dot_general(
        x_ref[...], w_ref[...],
        dimension_numbers=(((1,), (1,)), ((), ())),
        preferred_element_type=jnp.float32)

    @pl.when(k == pl.num_programs(2) - 1)
    def _():
        acc = acc_ref[...]
        b = b_ref[0].astype(jnp.float32)                 # (hpb, Dh)
        for h in range(hpb):                             # static unroll
            o_ref[0, 0, h] = (acc[:, h * dh:(h + 1) * dh]
                              + b[h:h + 1, :]).astype(o_ref.dtype)


def _stats_kernel(x_ref, cmx_ref, cmn_ref):
    # Per-channel running max/min over token tiles.  The (1, tc) output blocks
    # stay resident across the token (reduction) axis and double as accumulators.
    m = pl.program_id(1)
    x = x_ref[...]
    tile_mx = jnp.max(x, axis=0, keepdims=True)
    tile_mn = jnp.min(x, axis=0, keepdims=True)

    @pl.when(m == 0)
    def _():
        cmx_ref[...] = tile_mx
        cmn_ref[...] = tile_mn

    @pl.when(m > 0)
    def _():
        cmx_ref[...] = jnp.maximum(cmx_ref[...], tile_mx)
        cmn_ref[...] = jnp.minimum(cmn_ref[...], tile_mn)


def _flash_attn_kernel(q_ref, k_ref, v_ref, alibi_ref, mask_ref, o_ref,
                       m_acc, l_acc, acc_ref, *, scaling, neg_fill, out_is_bnc):
    # Online softmax over KV blocks for one (batch, head, q-tile).
    kv = pl.program_id(3)

    @pl.when(kv == 0)
    def _():
        m_acc[...] = jnp.full_like(m_acc, -jnp.inf)
        l_acc[...] = jnp.zeros_like(l_acc)
        acc_ref[...] = jnp.zeros_like(acc_ref)

    q = q_ref[0, 0, 0]                                 # (tq, Dh)
    k = k_ref[0, 0, 0]                                 # (tkv, Dh)
    v = v_ref[0, 0, 0]                                 # (tkv, Dh)
    alibi = alibi_ref[0, 0].astype(jnp.float32)        # (1, tkv)
    mask = mask_ref[0]                                 # (tq, tkv) int8, nonzero == masked

    # baddbmm(alibi, q, k^T, beta=1, alpha=scaling); scale q (tq*Dh muls) instead
    # of the (tq, tkv) score tile; f32 accumulation on the MXU.
    qs = q * jnp.asarray(scaling, q.dtype)
    s = alibi + lax.dot_general(qs, k,
                                dimension_numbers=(((1,), (1,)), ((), ())),
                                preferred_element_type=jnp.float32)
    s = jnp.where(mask != 0, neg_fill, s)

    m_prev = m_acc[...]
    m_new = jnp.maximum(m_prev, jnp.max(s, axis=-1, keepdims=True))
    corr = jnp.exp(m_prev - m_new)
    p = jnp.exp(s - m_new)
    l_acc[...] = corr * l_acc[...] + jnp.sum(p, axis=-1, keepdims=True)
    acc_ref[...] = corr * acc_ref[...] + jnp.dot(
        p.astype(v.dtype), v, preferred_element_type=jnp.float32)
    m_acc[...] = m_new

    @pl.when(kv == pl.num_programs(3) - 1)
    def _():
        out = (acc_ref[...] / l_acc[...]).astype(o_ref.dtype)   # exact normalization
        if out_is_bnc:
            o_ref[0] = out            # block (1, tq, Dh) on a (B, N, C) output
        else:
            o_ref[0, 0] = out         # block (1, 1, tq, Dh) on a (B, H, N, Dh) output


# --------------------------------- wrappers -----------------------------------

def linear_projection(x2d, weight, bias=None):
    """out = x2d @ weight.T (+ bias); weight in nn.Linear (Nout, K) layout."""
    M, K = x2d.shape
    Nout = weight.shape[0]
    tm_t, tn_t, tk_t = _proj_tile_targets()

    Mp = ((M + 7) // 8) * 8                 # pad tokens to a sublane multiple
    if Mp != M:
        x2d = jnp.pad(x2d, ((0, Mp - M), (0, 0)))
    tm = _aligned_tile(Mp, tm_t, 8)
    tn = _aligned_tile(Nout, tn_t, 128)
    tk = _aligned_tile(K, tk_t, 128)
    grid = (Mp // tm, Nout // tn, K // tk)

    x_spec = pl.BlockSpec((tm, tk), lambda i, j, k: (i, k))
    w_spec = pl.BlockSpec((tn, tk), lambda i, j, k: (j, k))
    o_spec = pl.BlockSpec((tm, tn), lambda i, j, k: (i, j))
    cparams = pltpu.CompilerParams(
        dimension_semantics=("parallel", "parallel", "arbitrary"),
        vmem_limit_bytes=_VMEM_LIMIT)
    scratch = [pltpu.VMEM((tm, tn), jnp.float32)]
    out_shape = jax.ShapeDtypeStruct((Mp, Nout), x2d.dtype)

    if bias is not None:
        b2d = bias.reshape(1, Nout)
        out = pl.pallas_call(
            _proj_bias_kernel, out_shape=out_shape,
            grid_spec=pltpu.PrefetchScalarGridSpec(
                num_scalar_prefetch=0, grid=grid,
                in_specs=[x_spec, w_spec,
                          pl.BlockSpec((1, tn), lambda i, j, k: (0, j))],
                out_specs=o_spec, scratch_shapes=scratch),
            compiler_params=cparams,
        )(x2d, weight, b2d)
    else:
        out = pl.pallas_call(
            _proj_kernel, out_shape=out_shape,
            grid_spec=pltpu.PrefetchScalarGridSpec(
                num_scalar_prefetch=0, grid=grid,
                in_specs=[x_spec, w_spec],
                out_specs=o_spec, scratch_shapes=scratch),
            compiler_params=cparams,
        )(x2d, weight)
    return out[:M] if Mp != M else out


def _plan_qkv_tiles(N, B, K, C, H, Dh, Nout):
    """Tile plan for writing the QKV projection directly as (3, B, H, N, Dh)."""
    if Nout != 3 * C or C != H * Dh:
        return None
    tm_t, tn_t, tk_t = _proj_tile_targets()
    # token tile: divides N; sublane-legal for both the x block and the 5-D out block
    tm = None
    if N % 8 == 0:
        t = min((tm_t // 8) * 8, N)
        while t >= 8:
            if N % t == 0:
                tm = t
                break
            t -= 8
    elif B == 1:
        tm = N                                   # full-extent block on both axes
    if tm is None:
        return None
    # feature tile: multiple of Dh, divides C, sublane-aligned; heads-per-block
    # must be a multiple of 8 or the full head count (for the (1, hpb, Dh) bias block)
    tn = None
    cap = min(C, max(tn_t, 8 * Dh))
    t = (cap // Dh) * Dh
    while t >= Dh:
        if C % t == 0 and t % 8 == 0:
            hpb = t // Dh
            if hpb % 8 == 0 or hpb == H:
                tn = t
                break
        t -= Dh
    if tn is None:
        return None
    tk = _aligned_tile(K, tk_t, 128)
    return tm, tn, tk


def qkv_projection(x2d, weight, bias, *, B, N, H, Dh):
    """x2d @ weight.T + bias, returned directly in (3, B, H, N, Dh) layout."""
    M, K = x2d.shape
    C = H * Dh
    Nout = weight.shape[0]
    plan = _plan_qkv_tiles(N, B, K, C, H, Dh, Nout)
    if plan is None:
        # TODO(synk): awkward (N, H, Dh) combinations fall back to a 2-D projection
        # plus one host-side 5-D relayout pass.
        out2d = linear_projection(x2d, weight, bias)
        return out2d.reshape(B, N, 3, H, Dh).transpose(2, 0, 3, 1, 4)

    tm, tn, tk = plan
    hpb = tn // Dh            # heads per output block
    cpt = C // tn             # head-blocks per q/k/v chunk
    npt = N // tm             # token blocks per batch
    grid = (M // tm, Nout // tn, K // tk)
    bias3 = bias.reshape(3, H, Dh)

    kernel = functools.partial(_qkv_proj_kernel, hpb=hpb, dh=Dh)
    return pl.pallas_call(
        kernel,
        out_shape=jax.ShapeDtypeStruct((3, B, H, N, Dh), x2d.dtype),
        grid_spec=pltpu.PrefetchScalarGridSpec(
            num_scalar_prefetch=0, grid=grid,
            in_specs=[
                pl.BlockSpec((tm, tk), lambda i, j, k: (i, k)),                  # x
                pl.BlockSpec((tn, tk), lambda i, j, k: (j, k)),                  # W
                pl.BlockSpec((1, hpb, Dh), lambda i, j, k: (j // cpt, j % cpt, 0)),  # bias
            ],
            out_specs=pl.BlockSpec(
                (1, 1, hpb, tm, Dh),
                lambda i, j, k: (j // cpt, i // npt, j % cpt, i % npt, 0)),
            scratch_shapes=[pltpu.VMEM((tm, tn), jnp.float32)]),
        compiler_params=pltpu.CompilerParams(
            dimension_semantics=("parallel", "parallel", "arbitrary"),
            vmem_limit_bytes=_VMEM_LIMIT),
    )(x2d, weight, bias3)


def channel_stats(x2d, *, tm_target=512, tc_target=1024):
    """Per-channel max/min over all tokens; returns ((1,C) max, (1,C) min)."""
    M, C = x2d.shape
    Mp = ((M + 7) // 8) * 8
    if Mp != M:
        # replicate the last row: min/max are unaffected by duplicates
        pad = jnp.broadcast_to(x2d[-1:], (Mp - M, C))
        x2d = jnp.concatenate([x2d, pad], axis=0)
    tm = _aligned_tile(Mp, tm_target, 8)
    tc = _aligned_tile(C, tc_target, 128)
    grid = (C // tc, Mp // tm)    # channel axis parallel (both v7x cores), tokens reduce
    return pl.pallas_call(
        _stats_kernel,
        out_shape=(jax.ShapeDtypeStruct((1, C), x2d.dtype),
                   jax.ShapeDtypeStruct((1, C), x2d.dtype)),
        grid_spec=pltpu.PrefetchScalarGridSpec(
            num_scalar_prefetch=0, grid=grid,
            in_specs=[pl.BlockSpec((tm, tc), lambda c, m: (m, c))],
            out_specs=(pl.BlockSpec((1, tc), lambda c, m: (0, c)),
                       pl.BlockSpec((1, tc), lambda c, m: (0, c)))),
        compiler_params=pltpu.CompilerParams(
            dimension_semantics=("parallel", "arbitrary"),
            vmem_limit_bytes=_VMEM_LIMIT),
    )(x2d)


def bloom_attention(qkv5, alibi, mask_i8, scaling, dtype, *,
                    tq_target=256, tkv_target=512):
    """qkv5: (3, B, H, N, Dh); alibi: (B, H, 1, N); mask_i8: (B, N, N), nonzero==masked.
    Returns (B, N, C) when Dh % 128 == 0, else (B, H, N, Dh)."""
    _, B, H, N, Dh = qkv5.shape
    tq = _aligned_tile(N, tq_target, 8)
    tkv = _aligned_tile(N, tkv_target, 128)
    n_q, n_kv = N // tq, N // tkv
    out_is_bnc = (Dh % 128 == 0)
    neg_fill = float(jnp.finfo(dtype).min)
    kernel = functools.partial(_flash_attn_kernel, scaling=float(scaling),
                               neg_fill=neg_fill, out_is_bnc=out_is_bnc)

    if out_is_bnc:
        out_shape = jax.ShapeDtypeStruct((B, N, H * Dh), dtype)
        out_spec = pl.BlockSpec((1, tq, Dh), lambda b, h, qi, kv: (b, qi, h))
    else:
        out_shape = jax.ShapeDtypeStruct((B, H, N, Dh), dtype)
        out_spec = pl.BlockSpec((1, 1, tq, Dh), lambda b, h, qi, kv: (b, h, qi, 0))

    return pl.pallas_call(
        kernel,
        out_shape=out_shape,
        grid_spec=pltpu.PrefetchScalarGridSpec(
            num_scalar_prefetch=0,
            grid=(B, H, n_q, n_kv),
            in_specs=[
                pl.BlockSpec((1, 1, 1, tq, Dh), lambda b, h, qi, kv: (0, b, h, qi, 0)),   # q
                pl.BlockSpec((1, 1, 1, tkv, Dh), lambda b, h, qi, kv: (1, b, h, kv, 0)),  # k
                pl.BlockSpec((1, 1, 1, tkv, Dh), lambda b, h, qi, kv: (2, b, h, kv, 0)),  # v
                pl.BlockSpec((1, 1, 1, tkv), lambda b, h, qi, kv: (b, h, 0, kv)),         # alibi
                pl.BlockSpec((1, tq, tkv), lambda b, h, qi, kv: (b, qi, kv)),             # mask
            ],
            out_specs=out_spec,
            scratch_shapes=[pltpu.VMEM((tq, 1), jnp.float32),     # running max m
                            pltpu.VMEM((tq, 1), jnp.float32),     # running sum l
                            pltpu.VMEM((tq, Dh), jnp.float32)]),  # output accumulator
        compiler_params=pltpu.CompilerParams(
            dimension_semantics=("parallel", "parallel", "parallel", "arbitrary"),
            vmem_limit_bytes=_VMEM_LIMIT),
    )(qkv5, qkv5, qkv5, alibi, mask_i8)


# ------------------------------- MigratorBase ---------------------------------

class MigratorBase:
    """JAX/Pallas port of the PyTorch MigratorBase constructor-time compute."""

    def __init__(self, input, weight, module_type, extra_dict=None):
        self.input = input            # (B, N, C)
        self.weight = weight          # (out_features, in_features)
        self.module_type = module_type
        self.extra_dict = extra_dict or {}
        self.dtype = input.dtype

        B, N, C = input.shape
        x2d = input.reshape(B * N, C)
        cmx, cmn = channel_stats(x2d)
        self.cmx = cmx[0]                                   # input.max(0)[0].max(0)[0]
        self.cmn = cmn[0]                                   # input.min(0)[0].min(0)[0]
        self.amx = jnp.maximum(jnp.max(self.cmx), jnp.asarray(0.0, self.dtype))
        self.amn = jnp.minimum(jnp.min(self.cmn), jnp.asarray(0.0, self.dtype))

        self.output = self.get_output(input, weight)

    def get_output(self, input, weight):
        if self.module_type == 'qkv':
            return self.qkv_function(input, weight)
        elif self.module_type == 'fc1':
            return self.fc1_function(input, weight)
        raise NotImplementedError

    def cac_scale(self, min_range, max_range):
        mx_scale = jnp.where(self.cmx > max_range, self.cmx / max_range, 1.0)
        mn_scale = jnp.where(self.cmn < min_range, self.cmn / min_range, 1.0)
        return jnp.maximum(mx_scale, mn_scale)

    def qkv_function(self, input, weight):
        ed = self.extra_dict
        B, N, C = input.shape
        H, Dh = ed['num_heads'], ed['head_dim']

        x2d = input.reshape(B * N, C)
        qkv5 = qkv_projection(x2d, weight, ed['bias'], B=B, N=N, H=H, Dh=Dh)  # (3,B,H,N,Dh)

        alibi = ed['alibi'].reshape(B, H, 1, N)
        # BLOOM masks broadcast over heads: keep one (B, N, N) int8 copy.
        mask_i8 = jnp.broadcast_to(ed['attention_mask'],
                                   (B, 1, N, N)).reshape(B, N, N).astype(jnp.int8)

        out = bloom_attention(qkv5, alibi, mask_i8, float(ed['scaling']), self.dtype)
        if out.ndim == 3:                                   # already (B, N, C)
            ctx = out
        else:                                               # (B, H, N, Dh) fallback
            ctx = out.transpose(0, 2, 1, 3).reshape(B, N, C)
        obs = ed['observation_mask']
        # data-dependent gather stays as an eager XLA op (matches torch semantics)
        return ctx[obs == 1].astype(jnp.float32)

    def fc1_function(self, input, weight):
        B, N, C = input.shape
        x2d = input.reshape(B * N, C)
        out = linear_projection(x2d, weight).reshape(B, N, weight.shape[0])
        obs = self.extra_dict['observation_mask']
        return out[obs == 1].astype(jnp.float32)

    def forward(self):
        pass


# --------------------------- pure-JAX reference --------------------------------

def _reference_qkv(x, weight, ed):
    B, N, C = x.shape
    H, Dh = ed['num_heads'], ed['head_dim']
    qkv = x @ weight.T + ed['bias']
    qkv = qkv.reshape(B, N, 3, H, Dh).transpose(2, 0, 3, 1, 4)
    q = qkv[0].reshape(B * H, N, Dh)
    k = jnp.swapaxes(qkv[1], -2, -1).reshape(B * H, Dh, N)
    v = qkv[2]
    attn = ed['alibi'] + ed['scaling'] * jnp.einsum('bnd,bdm->bnm', q, k)
    attn = attn.reshape(B, H, N, N)
    attn = jnp.where(ed['attention_mask'], jnp.finfo(x.dtype).min, attn)
    attn = jax.nn.softmax(attn.astype(jnp.float32), axis=-1).astype(x.dtype)
    out = jnp.einsum('bhnm,bhmd->bhnd', attn, v)
    out = out.transpose(0, 2, 1, 3).reshape(B, N, C)
    return out[ed['observation_mask'] == 1].astype(jnp.float32)


# ------------------------------------ main -------------------------------------

if __name__ == "__main__":
    key = jax.random.PRNGKey(0)
    B, N, C = 2, 8, 32
    H, Dh = 4, 8
    assert H * Dh == C

    kx, kwq, kb, kwf = jax.random.split(key, 4)
    x = jax.random.normal(kx, (B, N, C), jnp.float32)
    w_qkv = jax.random.normal(kwq, (3 * C, C), jnp.float32) * 0.05
    bias = jax.random.normal(kb, (3 * C,), jnp.float32) * 0.01
    w_fc1 = jax.random.normal(kwf, (4 * C, C), jnp.float32) * 0.05
    scaling = 1.0 / math.sqrt(Dh)

    # BLOOM-style alibi (B*H, 1, N)
    slopes = jnp.array([2.0 ** (-(8.0 / H) * (i + 1)) for i in range(H)], jnp.float32)
    pos = jnp.arange(N, dtype=jnp.float32)
    alibi = jnp.broadcast_to((slopes[:, None] * pos[None, :])[None], (B, H, N))
    alibi = alibi.reshape(B * H, 1, N)

    # causal mask, True == masked; broadcast over heads
    causal = jnp.triu(jnp.ones((N, N), dtype=bool), k=1)
    attention_mask = jnp.broadcast_to(causal[None, None], (B, 1, N, N))

    observation_mask = jnp.array(
        [[1, 1, 1, 1, 0, 0, 1, 0],
         [1, 0, 1, 1, 1, 1, 0, 0]], dtype=jnp.int32)

    extra_qkv = dict(bias=bias, num_heads=H, head_dim=Dh, alibi=alibi,
                     scaling=scaling, attention_mask=attention_mask,
                     observation_mask=observation_mask)
    extra_fc1 = dict(observation_mask=observation_mask)

    mig_qkv = MigratorBase(x, w_qkv, 'qkv', extra_qkv)
    mig_fc1 = MigratorBase(x, w_fc1, 'fc1', extra_fc1)

    jax.block_until_ready((mig_qkv.output, mig_fc1.output,
                           mig_qkv.cmx, mig_qkv.cmn, mig_qkv.amx, mig_qkv.amn))

    # correctness checks against the pure-JAX reference
    ref_qkv = _reference_qkv(x, w_qkv, extra_qkv)
    assert jnp.allclose(mig_qkv.output, ref_qkv, atol=2e-3, rtol=2e-3), \
        float(jnp.max(jnp.abs(mig_qkv.output - ref_qkv)))
    ref_fc1 = (x.reshape(B * N, C) @ w_fc1.T).reshape(B, N, -1)
    ref_fc1 = ref_fc1[observation_mask == 1].astype(jnp.float32)
    assert jnp.allclose(mig_fc1.output, ref_fc1, atol=1e-4, rtol=1e-4)
    assert jnp.allclose(mig_qkv.cmx, x.max(axis=(0, 1)))
    assert jnp.allclose(mig_qkv.cmn, x.min(axis=(0, 1)))
    assert jnp.allclose(mig_qkv.amx, jnp.maximum(x.max(), 0.0))
    assert jnp.allclose(mig_qkv.amn, jnp.minimum(x.min(), 0.0))

    print("KERNEL_OK")
</pallas_src>

<mosaic_0001>
module attributes {stable_mosaic.version = 11 : i64} {
  func.func @_stats_kernel(%arg0: i32, %arg1: i32, %arg2: memref<16x32xf32, #tpu.memory_space<vmem>>, %arg3: memref<1x32xf32, #tpu.memory_space<vmem>>, %arg4: memref<1x32xf32, #tpu.memory_space<vmem>>) attributes {dimension_semantics = [#tpu.dimension_semantics<parallel>, #tpu.dimension_semantics<arbitrary>], iteration_bounds = array<i64: 1, 1>, scalar_prefetch = 0 : i64, scratch_operands = 0 : i64, tpu.core_type = #tpu.core_type<tc>, window_params = [{transform_indices = @transform_0, window_bounds = array<i64: 16, 32>}, {transform_indices = @transform_1, window_bounds = array<i64: 1, 32>}, {transform_indices = @transform_2, window_bounds = array<i64: 1, 32>}]} {
    %c0 = arith.constant 0 : index
    %c0_0 = arith.constant 0 : index
    %0 = vector.load %arg2[%c0, %c0_0] : memref<16x32xf32, #tpu.memory_space<vmem>>, vector<16x32xf32>
    %cst = arith.constant dense<0xFF800000> : vector<32xf32>
    %1 = vector.multi_reduction <maximumf>, %0, %cst [0] : vector<16x32xf32> to vector<32xf32>
    %2 = vector.shape_cast %1 : vector<32xf32> to vector<1x32xf32>
    %cst_1 = arith.constant dense<0x7F800000> : vector<32xf32>
    %3 = vector.multi_reduction <minimumf>, %0, %cst_1 [0] : vector<16x32xf32> to vector<32xf32>
    %4 = vector.shape_cast %3 : vector<32xf32> to vector<1x32xf32>
    %c0_i32 = arith.constant 0 : i32
    %5 = arith.cmpi eq, %arg1, %c0_i32 : i32
    %6 = arith.extui %5 : i1 to i32
    %c0_i32_2 = arith.constant 0 : i32
    %7 = arith.cmpi ne, %6, %c0_i32_2 : i32
    scf.if %7 {
      %c0_5 = arith.constant 0 : index
      %c0_6 = arith.constant 0 : index
      %11 = vector.load %arg3[%c0_5, %c0_6] : memref<1x32xf32, #tpu.memory_space<vmem>>, vector<1x32xf32>
      tpu.vector_store %arg3[%c0_5, %c0_6], %2 {strides = array<i32>} : memref<1x32xf32, #tpu.memory_space<vmem>>, vector<1x32xf32>,
      %c0_7 = arith.constant 0 : index
      %c0_8 = arith.constant 0 : index
      %12 = vector.load %arg4[%c0_7, %c0_8] : memref<1x32xf32, #tpu.memory_space<vmem>>, vector<1x32xf32>
      tpu.vector_store %arg4[%c0_7, %c0_8], %4 {strides = array<i32>} : memref<1x32xf32, #tpu.memory_space<vmem>>, vector<1x32xf32>,
    } else {
    }
    %c0_i32_3 = arith.constant 0 : i32
    %8 = arith.cmpi sgt, %arg1, %c0_i32_3 : i32
    %9 = arith.extui %8 : i1 to i32
    %c0_i32_4 = arith.constant 0 : i32
    %10 = arith.cmpi ne, %9, %c0_i32_4 : i32
    scf.if %10 {
      %c0_5 = arith.constant 0 : index
      %c0_6 = arith.constant 0 : index
      %11 = vector.load %arg3[%c0_5, %c0_6] : memref<1x32xf32, #tpu.memory_space<vmem>>, vector<1x32xf32>
      %12 = arith.maximumf %11, %2 : vector<1x32xf32>
      %c0_7 = arith.constant 0 : index
      %c0_8 = arith.constant 0 : index
      %13 = vector.load %arg3[%c0_7, %c0_8] : memref<1x32xf32, #tpu.memory_space<vmem>>, vector<1x32xf32>
      tpu.vector_store %arg3[%c0_7, %c0_8], %12 {strides = array<i32>} : memref<1x32xf32, #tpu.memory_space<vmem>>, vector<1x32xf32>,
      %c0_9 = arith.constant 0 : index
      %c0_10 = arith.constant 0 : index
      %14 = vector.load %arg4[%c0_9, %c0_10] : memref<1x32xf32, #tpu.memory_space<vmem>>, vector<1x32xf32>
      %15 = arith.minimumf %14, %4 : vector<1x32xf32>
      %c0_11 = arith.constant 0 : index
      %c0_12 = arith.constant 0 : index
      %16 = vector.load %arg4[%c0_11, %c0_12] : memref<1x32xf32, #tpu.memory_space<vmem>>, vector<1x32xf32>
      tpu.vector_store %arg4[%c0_11, %c0_12], %15 {strides = array<i32>} : memref<1x32xf32, #tpu.memory_space<vmem>>, vector<1x32xf32>,
    } else {
    }
    return
  }
  func.func @transform_0(%arg0: i32, %arg1: i32) -> (i32, i32) {
    %c0_i32 = arith.constant 0 : i32
    return %arg1, %arg0 : i32, i32
  }
  func.func @transform_1(%arg0: i32, %arg1: i32) -> (i32, i32) {
    %c0_i32 = arith.constant 0 : i32
    %c0_i32_0 = arith.constant 0 : i32
    return %c0_i32, %arg0 : i32, i32
  }
  func.func @transform_2(%arg0: i32, %arg1: i32) -> (i32, i32) {
    %c0_i32 = arith.constant 0 : i32
    %c0_i32_0 = arith.constant 0 : i32
    return %c0_i32, %arg0 : i32, i32
  }
}

</mosaic_0001>

<bundles_post_ra>
// kernel: tpu_custom_call.1
= control target key start
LH: loop header
LB: loop body
LE: loop exit
PB: predicated region body
PF: predicated region fallthrough
CT: control target
= control target key end

     0   :  { %8 = vsyncpa [#allocation3], 0  ;;  %s194_s0 = inlined_call_operand.hbm [shape: f32[16,32], index: 0, kind: input, shape index: {}]   ;;  %s195_s1 = inlined_call_operand.hbm [shape: f32[1,32], index: 1, kind: output, shape index: {0}]   ;;  %s196_s2 = inlined_call_operand.hbm [shape: f32[1,32], index: 2, kind: output, shape index: {1}]  }
   0x1   :  { %9 = vsyncpa [#allocation4], 0 }
   0x2   :  { %10 = vsyncpa [#allocation7], 0  ;;  %s165_s9 = smov [#allocation2]  }
   0x3   :  { %s16_s10 = sshll.u32 %s165_s9, 4  ;;  %s17_s10 = int_to_ptr.vmem [resolvable:$true] %s16_s10 }
   0x4   :  { %s107_s11 = scalar_lea.vmem %s17_s10, 256  ;;  %p112_p1 = scmp.lt.s32.totalorder %s17_s10, %s17_s10 }
   0x5   :  { %p108_p0 = scmp.ne.s32.totalorder %s17_s10, %s107_s11  ;;  %p113_p2 = scmp.lt.s32.totalorder %s107_s11, %s107_s11 }
   0x7   :  { %p114_p3 = por %p113_p2, %p112_p1 }
   0x9   :  { %p115_p4 = pnand %p114_p3, %p108_p0 }
   0xb   :  { %118 = shalt.err (!%p115_p4)
}
   0xc   :  { %s166_s12 = smov 128   ;;  %s167_s13 = smov 8  }
   0xd   :  { %22 = dma.hbm_to_vmem [thread:$0]  %s194_s0, 256, %s17_s10, [#allocation3], %s166_s12, %s166_s12, %s167_s13  }
   0xe   :  { %159 = dma.done.wait [#allocation3], 256  }
   0xf   :  { %160 = vsyncadd [#allocation3], 4294967040  ;;  %vm28_vm0 = vcmask 261120   ;;  %v26_v0 = vld [vmem:[#allocation2] sm:$0xff]  ;;  %v27_v1 = vld [vmem:[#allocation2 + $0x8] sm:$0xff]  ;;  %s168_s0 = smov [#allocation5]  }
  0x10   :  { %v29_v2 = vsel %vm28_vm0, %v26_v0, -inf  ;;  %v30_v3 = vsel %vm28_vm0, %v27_v1, -inf  ;;  %v38_v4 = vsel %vm28_vm0, %v26_v0, inf  ;;  %v39_v5 = vsel %vm28_vm0, %v27_v1, inf  ;;  %s71_s16 = sshll.u32 %s168_s0, 4  ;;  %s169_s17 = smov [#allocation6]   ;;  %s72_s16 = int_to_ptr.vmem [resolvable:$true] %s71_s16 }
  0x11   :  { %v31_v6 = vmax.f32 %v29_v2, %v30_v3  ;;  %v40_v7 = vmin.f32 %v38_v4, %v39_v5  ;;  %s81_s18 = sshll.u32 %s169_s17, 4  ;;  %vm51_vm1 = vcmask 253952   ;;  %s119_s19 = scalar_lea.vmem %s72_s16, 16  ;;  %s82_s18 = int_to_ptr.vmem [resolvable:$true] %s81_s18 }
  0x12   :  { %p120_p5 = scmp.ne.s32.totalorder %s72_s16, %s119_s19  ;;  %s123_s20 = scalar_lea.vmem %s72_s16, 32 }
  0x13   :  { %v32_v8 = vrot.slane %v31_v6, 4  ;;  %v41_v9 = vrot.slane %v40_v7, 4  ;;  %p124_p6 = scmp.lt.s32.totalorder %s72_s16, %s72_s16  ;;  %p125_p7 = scmp.lt.s32.totalorder %s123_s20, %s119_s19 }
  0x15   :  { %v33_v10 = vmax.f32 %v31_v6, %v32_v8  ;;  %v42_v11 = vmin.f32 %v40_v7, %v41_v9  ;;  %p126_p8 = por %p125_p7, %p124_p6 }
  0x17   :  { %v34_v12 = vrot.slane %v33_v10, 2  ;;  %v43_v13 = vrot.slane %v42_v11, 2  ;;  %p127_p9 = pnand %p126_p8, %p120_p5 }
  0x19   :  { %v35_v14 = vmax.f32 %v33_v10, %v34_v12  ;;  %v44_v15 = vmin.f32 %v42_v11, %v43_v13 }
  0x1b   :  { %v36_v16 = vrot.slane %v35_v14, 1  ;;  %v45_v17 = vrot.slane %v44_v15, 1 }
  0x1d   :  { %v37_v18 = vmax.f32 %v35_v14, %v36_v16  ;;  %v46_v19 = vmin.f32 %v44_v15, %v45_v17 }
  0x1f   :  { %52 = vst.msk [vmem:[#allocation5] sm:$0x1] %vm51_vm1, %v37_v18  ;;  %53 = vst.msk [vmem:[#allocation6] sm:$0x1] %vm51_vm1, %v46_v19 }
  0x20   :  { %130 = shalt.err (!%p127_p9)
}
  0x21   :  { %74 = dma.vmem_to_hbm [thread:$0]  %s72_s16, 16, %s195_s1, [#allocation4]  }
  0x22   :  { %s139_s23 = scalar_lea.vmem %s82_s18, 16  ;;  %s143_s24 = scalar_lea.vmem %s82_s18, 32 }
  0x23   :  { %p140_p10 = scmp.ne.s32.totalorder %s82_s18, %s139_s23  ;;  %p144_p11 = scmp.lt.s32.totalorder %s82_s18, %s82_s18 }
  0x24   :  { %p145_p12 = scmp.lt.s32.totalorder %s143_s24, %s139_s23 }
  0x26   :  { %p146_p13 = por %p145_p12, %p144_p11 }
  0x28   :  { %p147_p0 = pnand %p146_p13, %p140_p10 }
  0x2a   :  { %150 = shalt.err (!%p147_p0)
}
  0x2b   :  { %84 = dma.vmem_to_hbm [thread:$0]  %s82_s18, 16, %s196_s2, [#allocation7]  }
  0x2c   :  { %161 = dma.done.wait [#allocation4], 16  }
  0x2d   :  { %162 = vsyncadd [#allocation4], 4294967280 }
  0x2e   :  { %163 = dma.done.wait [#allocation7], 16  }
  0x2f   :  { %164 = vsyncadd [#allocation7], 4294967280 }
  0x30   :  { %91 = vsyncpa [#allocation3], 1 }
  0x31   :  { %92 = vsyncpa [#allocation4], 1 }
  0x32   :  { %93 = vsyncpa [#allocation7], 1 }

</bundles_post_ra>
